<compile_context>
chip_gen: v7x
topology: tpu7x:2x2x1
jax: 0.10.0
libtpu: 0.0.40
codegen_flags: <defaults>
</compile_context>

<pallas_src>
import functools

import jax
import jax.numpy as jnp
from jax.experimental import pallas as pl
from jax.experimental.pallas import tpu as pltpu


def _fused_mlp_kernel(*refs, num_layers: int):
    """refs = (x_ref, w0, b0, w1, b1, ..., w_{n-1}, b_{n-1}, o_ref).

    x:  (TB, in_dim)          w_l: (in_l, out_l)   b_l: (1, out_l)
    o:  (TB, out_last)
    The layer loop is unrolled statically; activations live in vregs/VMEM.
    """
    x_ref = refs[0]
    o_ref = refs[-1]
    param_refs = refs[1:-1]

    x = x_ref[...].astype(jnp.float32)
    for l in range(num_layers):
        w = param_refs[2 * l][...]
        b = param_refs[2 * l + 1][...]
        x = jnp.dot(x, w, preferred_element_type=jnp.float32) + b
        if l < num_layers - 1:  # ReLU between layers, not after the last
            x = jnp.maximum(x, 0.0)
    o_ref[...] = x.astype(o_ref.dtype)


def _pick_batch_tile(batch: int) -> int:
    # Multiple of 8 sublanes, dividing the batch; fall back to full batch.
    for tb in (512, 256, 128, 64, 32, 16, 8):
        if batch % tb == 0:
            return tb
    return batch


def fused_mlp_forward(x, params):
    """Run the whole MLP (x @ W0 + b0, ReLU, ..., x @ W_{n-1} + b_{n-1}) in one kernel.

    params: list of (w, b) with w of shape (in_features, out_features) -- already
            transposed relative to PyTorch's (out, in) storage.
    """
    batch, in_dim = x.shape
    num_layers = len(params)
    out_dim = params[-1][0].shape[1]

    tb = _pick_batch_tile(batch)
    grid = (batch // tb,)

    # Flatten params -> [w0, b0, w1, b1, ...] with biases as (1, out) rows.
    flat_inputs = []
    in_specs = [pl.BlockSpec((tb, in_dim), lambda i: (i, 0))]  # x: tiled over batch
    for w, b in params:
        d_in, d_out = w.shape
        flat_inputs.append(w)
        flat_inputs.append(b.reshape(1, d_out))
        # Weights/biases are grid-invariant: same block every step -> stay resident.
        in_specs.append(pl.BlockSpec((d_in, d_out), lambda i: (0, 0)))
        in_specs.append(pl.BlockSpec((1, d_out), lambda i: (0, 0)))

    kernel = functools.partial(_fused_mlp_kernel, num_layers=num_layers)
    return pl.pallas_call(
        kernel,
        out_shape=jax.ShapeDtypeStruct((batch, out_dim), x.dtype),
        grid=grid,
        in_specs=in_specs,
        out_specs=pl.BlockSpec((tb, out_dim), lambda i: (i, 0)),
        compiler_params=pltpu.CompilerParams(
            dimension_semantics=("parallel",),
        ),
    )(x, *flat_inputs)


class RegressionNNPallas:
    """JAX/Pallas port of the PyTorch RegressionNN module.

    fc_layers = [Linear(input_dim, d0), ReLU, Linear(d0, d1), ReLU, ..., Linear(d_{n-2}, d_{n-1})]
    The entire stack is fused into a single Pallas kernel.
    Weights are stored pre-transposed as (in_features, out_features).
    """

    def __init__(self, input_dim, output_dims, key):
        self.params = []
        dims = [input_dim] + list(output_dims)
        for i in range(len(output_dims)):
            fan_in, fan_out = dims[i], dims[i + 1]
            key, kw, kb = jax.random.split(key, 3)
            # Mimic torch's default init U(-1/sqrt(fan_in), 1/sqrt(fan_in)),
            # but store W as (in, out) so the kernel needs no transpose.
            bound = 1.0 / (fan_in ** 0.5)
            w = jax.random.uniform(kw, (fan_in, fan_out), jnp.float32, -bound, bound)
            b = jax.random.uniform(kb, (fan_out,), jnp.float32, -bound, bound)
            self.params.append((w, b))

    def __call__(self, x):
        return fused_mlp_forward(x, self.params)

    def reference(self, x):
        n = len(self.params)
        for i, (w, b) in enumerate(self.params):
            x = x @ w + b
            if i < n - 1:
                x = jnp.maximum(x, 0.0)
        return x


if __name__ == "__main__":
    key = jax.random.PRNGKey(0)
    k_in, k_model = jax.random.split(key)

    batch = 64          # multiple of 8 -> batch-tiled grid with "parallel" semantics
    input_dim = 32
    output_dims = [64, 32, 16]

    x = jax.random.normal(k_in, (batch, input_dim), dtype=jnp.float32)

    model = RegressionNNPallas(input_dim, output_dims, k_model)

    y = model(x)
    y = jax.block_until_ready(y)

    y_ref = model.reference(x)
    assert y.shape == (batch, output_dims[-1])
    assert jnp.allclose(y, y_ref, atol=1e-5, rtol=1e-5), "mismatch vs reference"

    print("KERNEL_OK")
</pallas_src>

<mosaic_0001>
module attributes {stable_mosaic.version = 11 : i64} {
  func.func @_fused_mlp_kernel(%arg0: i32, %arg1: memref<64x32xf32, #tpu.memory_space<vmem>>, %arg2: memref<32x64xf32, #tpu.memory_space<vmem>>, %arg3: memref<1x64xf32, #tpu.memory_space<vmem>>, %arg4: memref<64x32xf32, #tpu.memory_space<vmem>>, %arg5: memref<1x32xf32, #tpu.memory_space<vmem>>, %arg6: memref<32x16xf32, #tpu.memory_space<vmem>>, %arg7: memref<1x16xf32, #tpu.memory_space<vmem>>, %arg8: memref<64x16xf32, #tpu.memory_space<vmem>>) attributes {dimension_semantics = [#tpu.dimension_semantics<parallel>], iteration_bounds = array<i64: 1>, scalar_prefetch = 0 : i64, scratch_operands = 0 : i64, tpu.core_type = #tpu.core_type<tc>, window_params = [{transform_indices = @transform_0, window_bounds = array<i64: 64, 32>}, {pipeline_mode = #tpu.pipeline_mode<synchronous>, transform_indices = @transform_1, window_bounds = array<i64: 32, 64>}, {pipeline_mode = #tpu.pipeline_mode<synchronous>, transform_indices = @transform_2, window_bounds = array<i64: 1, 64>}, {pipeline_mode = #tpu.pipeline_mode<synchronous>, transform_indices = @transform_3, window_bounds = array<i64: 64, 32>}, {pipeline_mode = #tpu.pipeline_mode<synchronous>, transform_indices = @transform_4, window_bounds = array<i64: 1, 32>}, {pipeline_mode = #tpu.pipeline_mode<synchronous>, transform_indices = @transform_5, window_bounds = array<i64: 32, 16>}, {pipeline_mode = #tpu.pipeline_mode<synchronous>, transform_indices = @transform_6, window_bounds = array<i64: 1, 16>}, {transform_indices = @transform_7, window_bounds = array<i64: 64, 16>}]} {
    %c0 = arith.constant 0 : index
    %c0_0 = arith.constant 0 : index
    %0 = vector.load %arg1[%c0, %c0_0] : memref<64x32xf32, #tpu.memory_space<vmem>>, vector<64x32xf32>
    %c0_1 = arith.constant 0 : index
    %c0_2 = arith.constant 0 : index
    %1 = vector.load %arg2[%c0_1, %c0_2] : memref<32x64xf32, #tpu.memory_space<vmem>>, vector<32x64xf32>
    %c0_3 = arith.constant 0 : index
    %c0_4 = arith.constant 0 : index
    %2 = vector.load %arg3[%c0_3, %c0_4] : memref<1x64xf32, #tpu.memory_space<vmem>>, vector<1x64xf32>
    %cst = arith.constant dense<0.000000e+00> : vector<64x64xf32>
    %3 = tpu.matmul %0, %1, %cst {dimension_numbers = #tpu.dot_dimension_numbers<[1], [0], [0], [1], [0, 0, 1, 1], [], []>} : vector<64x32xf32>, vector<32x64xf32>, vector<64x64xf32> -> vector<64x64xf32>
    %4 = vector.broadcast %2 : vector<1x64xf32> to vector<64x64xf32>
    %5 = arith.addf %3, %4 : vector<64x64xf32>
    %cst_5 = arith.constant 0.000000e+00 : f32
    %6 = vector.broadcast %cst_5 : f32 to vector<64x64xf32>
    %7 = arith.maximumf %5, %6 : vector<64x64xf32>
    %c0_6 = arith.constant 0 : index
    %c0_7 = arith.constant 0 : index
    %8 = vector.load %arg4[%c0_6, %c0_7] : memref<64x32xf32, #tpu.memory_space<vmem>>, vector<64x32xf32>
    %c0_8 = arith.constant 0 : index
    %c0_9 = arith.constant 0 : index
    %9 = vector.load %arg5[%c0_8, %c0_9] : memref<1x32xf32, #tpu.memory_space<vmem>>, vector<1x32xf32>
    %cst_10 = arith.constant dense<0.000000e+00> : vector<64x32xf32>
    %10 = tpu.matmul %7, %8, %cst_10 {dimension_numbers = #tpu.dot_dimension_numbers<[1], [0], [0], [1], [0, 0, 1, 1], [], []>} : vector<64x64xf32>, vector<64x32xf32>, vector<64x32xf32> -> vector<64x32xf32>
    %11 = vector.broadcast %9 : vector<1x32xf32> to vector<64x32xf32>
    %12 = arith.addf %10, %11 : vector<64x32xf32>
    %cst_11 = arith.constant 0.000000e+00 : f32
    %13 = vector.broadcast %cst_11 : f32 to vector<64x32xf32>
    %14 = arith.maximumf %12, %13 : vector<64x32xf32>
    %c0_12 = arith.constant 0 : index
    %c0_13 = arith.constant 0 : index
    %15 = vector.load %arg6[%c0_12, %c0_13] : memref<32x16xf32, #tpu.memory_space<vmem>>, vector<32x16xf32>
    %c0_14 = arith.constant 0 : index
    %c0_15 = arith.constant 0 : index
    %16 = vector.load %arg7[%c0_14, %c0_15] : memref<1x16xf32, #tpu.memory_space<vmem>>, vector<1x16xf32>
    %cst_16 = arith.constant dense<0.000000e+00> : vector<64x16xf32>
    %17 = tpu.matmul %14, %15, %cst_16 {dimension_numbers = #tpu.dot_dimension_numbers<[1], [0], [0], [1], [0, 0, 1, 1], [], []>} : vector<64x32xf32>, vector<32x16xf32>, vector<64x16xf32> -> vector<64x16xf32>
    %18 = vector.broadcast %16 : vector<1x16xf32> to vector<64x16xf32>
    %19 = arith.addf %17, %18 : vector<64x16xf32>
    %c0_17 = arith.constant 0 : index
    %c0_18 = arith.constant 0 : index
    %20 = vector.load %arg8[%c0_17, %c0_18] : memref<64x16xf32, #tpu.memory_space<vmem>>, vector<64x16xf32>
    tpu.vector_store %arg8[%c0_17, %c0_18], %19 {strides = array<i32>} : memref<64x16xf32, #tpu.memory_space<vmem>>, vector<64x16xf32>,
    return
  }
  func.func @transform_0(%arg0: i32) -> (i32, i32) {
    %c0_i32 = arith.constant 0 : i32
    %c0_i32_0 = arith.constant 0 : i32
    return %arg0, %c0_i32 : i32, i32
  }
  func.func @transform_1(%arg0: i32) -> (i32, i32) {
    %c0_i32 = arith.constant 0 : i32
    %c0_i32_0 = arith.constant 0 : i32
    %c0_i32_1 = arith.constant 0 : i32
    return %c0_i32, %c0_i32_0 : i32, i32
  }
  func.func @transform_2(%arg0: i32) -> (i32, i32) {
    %c0_i32 = arith.constant 0 : i32
    %c0_i32_0 = arith.constant 0 : i32
    %c0_i32_1 = arith.constant 0 : i32
    return %c0_i32, %c0_i32_0 : i32, i32
  }
  func.func @transform_3(%arg0: i32) -> (i32, i32) {
    %c0_i32 = arith.constant 0 : i32
    %c0_i32_0 = arith.constant 0 : i32
    %c0_i32_1 = arith.constant 0 : i32
    return %c0_i32, %c0_i32_0 : i32, i32
  }
  func.func @transform_4(%arg0: i32) -> (i32, i32) {
    %c0_i32 = arith.constant 0 : i32
    %c0_i32_0 = arith.constant 0 : i32
    %c0_i32_1 = arith.constant 0 : i32
    return %c0_i32, %c0_i32_0 : i32, i32
  }
  func.func @transform_5(%arg0: i32) -> (i32, i32) {
    %c0_i32 = arith.constant 0 : i32
    %c0_i32_0 = arith.constant 0 : i32
    %c0_i32_1 = arith.constant 0 : i32
    return %c0_i32, %c0_i32_0 : i32, i32
  }
  func.func @transform_6(%arg0: i32) -> (i32, i32) {
    %c0_i32 = arith.constant 0 : i32
    %c0_i32_0 = arith.constant 0 : i32
    %c0_i32_1 = arith.constant 0 : i32
    return %c0_i32, %c0_i32_0 : i32, i32
  }
  func.func @transform_7(%arg0: i32) -> (i32, i32) {
    %c0_i32 = arith.constant 0 : i32
    %c0_i32_0 = arith.constant 0 : i32
    return %arg0, %c0_i32 : i32, i32
  }
}

</mosaic_0001>

<bundles_post_ra>
// kernel: tpu_custom_call.1
= control target key start
LH: loop header
LB: loop body
LE: loop exit
PB: predicated region body
PF: predicated region fallthrough
CT: control target
= control target key end

     0   :  { %vm45_vm0 = vcmask 261120   ;;  %vm198_vm1 = vcmask 523264   ;;  %vm476_vm2 = vcmask 130048   ;;  %s837_s1 = inlined_call_operand.vmem [shape: f32[32,64], index: 1, kind: input, shape index: {}]   ;;  %s838_s0 = inlined_call_operand.vmem [shape: f32[64,32], index: 0, kind: input, shape index: {}]   ;;  %s839_s3 = inlined_call_operand.vmem [shape: f32[64,32], index: 3, kind: input, shape index: {}]   ;;  %s840_s5 = inlined_call_operand.vmem [shape: f32[32,16], index: 5, kind: input, shape index: {}]   ;;  %s841_s2 = inlined_call_operand.vmem [shape: f32[1,64], index: 2, kind: input, shape index: {}]   ;;  %s842_s4 = inlined_call_operand.vmem [shape: f32[1,32], index: 4, kind: input, shape index: {}]   ;;  %s843_s6 = inlined_call_operand.vmem [shape: f32[1,16], index: 6, kind: input, shape index: {}]   ;;  %s844_s7 = inlined_call_operand.vmem [shape: f32[64,16], index: 7, kind: output, shape index: {}]  }
   0x1   :  { %v34_v0 = vld [vmem:[%s837_s1] sm:$0xff]  ;;  %v35_v1 = vld [vmem:[%s837_s1 + $0x8] sm:$0xff]  ;;  %v36_v2 = vld [vmem:[%s837_s1 + $0x10] sm:$0xff] }
   0x2   :  { %v624_v3 = vpack.c.bf16 %v35_v1, %v34_v0  ;;  %v37_v4 = vld [vmem:[%s837_s1 + $0x18] sm:$0xff]  ;;  %v26_v5 = vld [vmem:[%s838_s0] sm:$0xff]  ;;  %v184_v8 = vld [vmem:[%s839_s3 + $0x8] sm:$0xff] }
   0x3   :  { %v628_v6 = vpack.c.bf16 %v37_v4, %v36_v2  ;;  %564 = vmatprep.mubr.msk.f32.mxu0 %vm45_vm0, %v26_v5  ;;  %v183_v7 = vld [vmem:[%s839_s3] sm:$0xff]  ;;  %v185_v9 = vld [vmem:[%s839_s3 + $0x10] sm:$0xff]  ;;  %v186_v11 = vld [vmem:[%s839_s3 + $0x18] sm:$0xff] }
   0x4   :  { %625 = vmatprep.subr.bf16.mxu0 %v624_v3  ;;  %v632_v10 = vpack.c.bf16 %v184_v8, %v183_v7  ;;  %v636_v12 = vpack.c.bf16 %v186_v11, %v185_v9  ;;  %v187_v13 = vld [vmem:[%s839_s3 + $0x20] sm:$0xff]  ;;  %v188_v14 = vld [vmem:[%s839_s3 + $0x28] sm:$0xff]  ;;  %v28_v16 = vld [vmem:[%s838_s0 + $0x10] sm:$0xff] }
   0x5   :  { %627 = vmatpush3.bf16.msra.mxu0 %v624_v3  ;;  %v27_v15 = vld [vmem:[%s838_s0 + $0x8] sm:$0xff]  ;;  %v640_v17 = vpack.c.bf16 %v188_v14, %v187_v13  ;;  %v29_v18 = vld [vmem:[%s838_s0 + $0x18] sm:$0xff]  ;;  %v30_v19 = vld [vmem:[%s838_s0 + $0x20] sm:$0xff] }
   0x6   :  { %629 = vmatprep.subr.bf16.mxu0 %v628_v6  ;;  %633 = vmatprep.subr.bf16.mxu1 %v632_v10  ;;  %v31_v20 = vld [vmem:[%s838_s0 + $0x28] sm:$0xff]  ;;  %v32_v21 = vld [vmem:[%s838_s0 + $0x30] sm:$0xff]  ;;  %v33_v22 = vld [vmem:[%s838_s0 + $0x38] sm:$0xff] }
   0x7   :  { %635 = vmatpush3.bf16.msra.mxu1 %v632_v10  ;;  %v189_v23 = vld [vmem:[%s839_s3 + $0x30] sm:$0xff]  ;;  %v190_v24 = vld [vmem:[%s839_s3 + $0x38] sm:$0xff]  ;;  %v336_v26 = vld [vmem:[%s840_s5] sm:$0xff] }
   0x8   :  { %637 = vmatprep.subr.bf16.mxu1 %v636_v12  ;;  %v644_v25 = vpack.c.bf16 %v190_v24, %v189_v23  ;;  %v337_v27 = vld [vmem:[%s840_s5 + $0x8] sm:$0xff]  ;;  %v489_v29 = vld [vmem:[%s841_s2] ss:$0 sm:$0xff]  ;;  %v338_v54 = vld [vmem:[%s840_s5 + $0x10] sm:$0xff] }
   0x9   :  { %631 = vmatpush3.bf16.msra.mxu0 %v628_v6  ;;  %v648_v28 = vpack.c.bf16 %v337_v27, %v336_v26  ;;  %v339_v55 = vld [vmem:[%s840_s5 + $0x18] sm:$0xff]  ;;  %v498_v57 = vld [vmem:[%s842_s4] ss:$0 sm:$0xff] }
   0xa   :  { %v652_v56 = vpack.c.bf16 %v339_v55, %v338_v54 }
   0xb   :  { %639 = vmatpush3.bf16.msra.mxu1 %v636_v12  ;;  %649 = vmatprep.subr.bf16.mxu0 %v648_v28 }
   0xc   :  { %565 = vmatmul.mubr.msk.f32.vlgmr.msra.gmra.mrb[0].mxu0 %vm45_vm0, %v27_v15  ;;  %641 = vmatprep.subr.bf16.mxu1 %v640_v17 }
   0xd   :  { %567 = vmatprep.mubr.msk.f32.mxu0 %vm45_vm0, %v28_v16  ;;  %651 = vmatpush3.bf16.msra.mxu0 %v648_v28 }
   0xe   :  { %653 = vmatprep.subr.bf16.mxu0 %v652_v56 }
   0xf   :  { %643 = vmatpush3.bf16.msra.mxu1 %v640_v17 }
  0x10   :  { %568 = vmatmul.mubr.msk.f32.gmra.mrb[2].mxu0 %vm45_vm0, %v29_v18  ;;  %645 = vmatprep.subr.bf16.mxu1 %v644_v25  ;;  %v507_v18 = vld [vmem:[%s843_s6] ss:$0 sm:$0xff] }
  0x11   :  { %570 = vmatprep.mubr.msk.f32.mxu0 %vm45_vm0, %v30_v19  ;;  %655 = vmatpush3.bf16.msra.mxu0 %v652_v56 }
  0x13   :  { %647 = vmatpush3.bf16.msra.mxu1 %v644_v25 }
  0x14   :  { %571 = vmatmul.mubr.msk.f32.gmra.mrb[4].mxu0 %vm45_vm0, %v31_v20  ;;  %656 = vmatprep.subr.bf16.mxu1 %v648_v28 }
  0x15   :  { %573 = vmatprep.mubr.msk.f32.mxu0 %vm45_vm0, %v32_v21 }
  0x18   :  { %574 = vmatmul.mubr.msk.f32.gmra.mrb[6].mxu0 %vm45_vm0, %v33_v22 }
  0xdf   :  { %v566_v30 = vpop.f32.mrb[0].mxu0 }
  0xe0   :  { %v142_v31 = vadd.f32 %v566_v30, %v489_v29  ;;  %v136_v32 = vpop.f32.mrb[1].mxu0 }
  0xe1   :  { %v137_v33 = vadd.f32 %v489_v29, %v136_v32 }
  0xe2   :  { %v176_v36 = vmax.f32 %v142_v31, 0.0 }
  0xe3   :  { %v175_v34 = vmax.f32 %v137_v33, 0.0  ;;  %v569_v35 = vpop.f32.mrb[2].mxu0 }
  0xe4   :  { %v152_v37 = vadd.f32 %v569_v35, %v489_v29  ;;  %v146_v38 = vpop.f32.mrb[3].mxu0 }
  0xe5   :  { %v147_v39 = vadd.f32 %v489_v29, %v146_v38  ;;  %592 = vmatprep.mubr.msk.f32.mxu1 %vm198_vm1, %v175_v34 }
  0xe6   :  { %593 = vmatmul.mubr.msk.f32.vlgmr.msra.gmra.mrb[0].mxu1 %vm198_vm1, %v176_v36  ;;  %v178_v42 = vmax.f32 %v152_v37, 0.0 }
  0xe7   :  { %v177_v40 = vmax.f32 %v147_v39, 0.0  ;;  %v572_v41 = vpop.f32.mrb[4].mxu0  ;;  %658 = vmatpush3.bf16.msra.mxu1 %v648_v28 }
  0xe8   :  { %v162_v43 = vadd.f32 %v572_v41, %v489_v29  ;;  %v156_v44 = vpop.f32.mrb[5].mxu0  ;;  %657 = vmatprep.subr.bf16.mxu1 %v652_v56 }
  0xe9   :  { %v157_v45 = vadd.f32 %v489_v29, %v156_v44  ;;  %595 = vmatprep.mubr.msk.f32.mxu1 %vm198_vm1, %v177_v40 }
  0xea   :  { %596 = vmatmul.mubr.msk.f32.gmra.mrb[2].mxu1 %vm198_vm1, %v178_v42  ;;  %v180_v48 = vmax.f32 %v162_v43, 0.0 }
  0xeb   :  { %v179_v46 = vmax.f32 %v157_v45, 0.0  ;;  %v575_v47 = vpop.f32.mrb[6].mxu0  ;;  %659 = vmatpush3.bf16.msra.mxu1 %v652_v56 }
  0xec   :  { %v172_v49 = vadd.f32 %v575_v47, %v489_v29  ;;  %v166_v50 = vpop.f32.mrb[7].mxu0 }
  0xed   :  { %v167_v51 = vadd.f32 %v489_v29, %v166_v50  ;;  %598 = vmatprep.mubr.msk.f32.mxu1 %vm198_vm1, %v179_v46 }
  0xee   :  { %599 = vmatmul.mubr.msk.f32.gmra.mrb[4].mxu1 %vm198_vm1, %v180_v48  ;;  %v182_v53 = vmax.f32 %v172_v49, 0.0 }
  0xef   :  { %v181_v52 = vmax.f32 %v167_v51, 0.0 }
  0xf1   :  { %601 = vmatprep.mubr.msk.f32.mxu1 %vm198_vm1, %v181_v52 }
  0xf2   :  { %602 = vmatmul.mubr.msk.f32.gmra.mrb[6].mxu1 %vm198_vm1, %v182_v53 }
 0x1b9   :  { %v594_v58 = vpop.f32.mrb[0].mxu1 }
 0x1ba   :  { %v295_v59 = vadd.f32 %v594_v58, %v498_v57  ;;  %v289_v60 = vpop.f32.mrb[1].mxu1 }
 0x1bb   :  { %v290_v61 = vadd.f32 %v498_v57, %v289_v60 }
 0x1bc   :  { %v329_v0 = vmax.f32 %v295_v59, 0.0 }
 0x1bd   :  { %v328_v62 = vmax.f32 %v290_v61, 0.0  ;;  %v597_v63 = vpop.f32.mrb[2].mxu1 }
 0x1be   :  { %v305_v1 = vadd.f32 %v597_v63, %v498_v57  ;;  %v299_v2 = vpop.f32.mrb[3].mxu1 }
 0x1bf   :  { %v300_v3 = vadd.f32 %v498_v57, %v299_v2  ;;  %612 = vmatprep.mubr.msk.f32.mxu0 %vm45_vm0, %v328_v62 }
 0x1c0   :  { %613 = vmatmul.mubr.msk.f32.vlgmr.msra.gmra.mrb[8].mxu0 %vm45_vm0, %v329_v0  ;;  %v331_v6 = vmax.f32 %v305_v1, 0.0 }
 0x1c1   :  { %v330_v4 = vmax.f32 %v300_v3, 0.0  ;;  %v600_v5 = vpop.f32.mrb[4].mxu1 }
 0x1c2   :  { %v315_v7 = vadd.f32 %v600_v5, %v498_v57  ;;  %v309_v8 = vpop.f32.mrb[5].mxu1 }
 0x1c3   :  { %v310_v9 = vadd.f32 %v498_v57, %v309_v8  ;;  %615 = vmatprep.mubr.msk.f32.mxu0 %vm45_vm0, %v330_v4 }
 0x1c4   :  { %616 = vmatmul.mubr.msk.f32.gmra.mrb[10].mxu0 %vm45_vm0, %v331_v6  ;;  %v333_v12 = vmax.f32 %v315_v7, 0.0 }
 0x1c5   :  { %v332_v10 = vmax.f32 %v310_v9, 0.0  ;;  %v603_v11 = vpop.f32.mrb[6].mxu1 }
 0x1c6   :  { %v325_v13 = vadd.f32 %v603_v11, %v498_v57  ;;  %v319_v14 = vpop.f32.mrb[7].mxu1 }
 0x1c7   :  { %v320_v15 = vadd.f32 %v498_v57, %v319_v14  ;;  %618 = vmatprep.mubr.msk.f32.mxu0 %vm45_vm0, %v332_v10 }
 0x1c8   :  { %619 = vmatmul.mubr.msk.f32.gmra.mrb[12].mxu0 %vm45_vm0, %v333_v12  ;;  %v335_v17 = vmax.f32 %v325_v13, 0.0 }
 0x1c9   :  { %v334_v16 = vmax.f32 %v320_v15, 0.0 }
 0x1cb   :  { %621 = vmatprep.mubr.msk.f32.mxu1 %vm45_vm0, %v334_v16 }
 0x1cc   :  { %622 = vmatmul.mubr.msk.f32.vlgmr.msra.gmra.mrb[8].mxu1 %vm45_vm0, %v335_v17 }
 0x293   :  { %v614_v19 = vpop.f32.mrb[8].mxu0 }
 0x294   :  { %v443_v20 = vadd.f32 %v614_v19, %v507_v18  ;;  %v437_v21 = vpop.f32.mrb[9].mxu0 }
 0x295   :  { %v438_v22 = vadd.f32 %v507_v18, %v437_v21 }
 0x296   :  { %478 = vst.msk [vmem:[%s844_s7 + $0x8] sm:$0xff] %vm476_vm2, %v443_v20 }
 0x297   :  { %477 = vst.msk [vmem:[%s844_s7] sm:$0xff] %vm476_vm2, %v438_v22  ;;  %v617_v23 = vpop.f32.mrb[10].mxu0 }
 0x298   :  { %v453_v24 = vadd.f32 %v617_v23, %v507_v18  ;;  %v447_v25 = vpop.f32.mrb[11].mxu0 }
 0x299   :  { %v448_v26 = vadd.f32 %v507_v18, %v447_v25 }
 0x29a   :  { %480 = vst.msk [vmem:[%s844_s7 + $0x18] sm:$0xff] %vm476_vm2, %v453_v24 }
 0x29b   :  { %479 = vst.msk [vmem:[%s844_s7 + $0x10] sm:$0xff] %vm476_vm2, %v448_v26  ;;  %v620_v27 = vpop.f32.mrb[12].mxu0 }
 0x29c   :  { %v463_v28 = vadd.f32 %v620_v27, %v507_v18  ;;  %v457_v29 = vpop.f32.mrb[13].mxu0 }
 0x29d   :  { %v458_v30 = vadd.f32 %v507_v18, %v457_v29 }
 0x29e   :  { %482 = vst.msk [vmem:[%s844_s7 + $0x28] sm:$0xff] %vm476_vm2, %v463_v28 }
 0x29f   :  { %481 = vst.msk [vmem:[%s844_s7 + $0x20] sm:$0xff] %vm476_vm2, %v458_v30  ;;  %v623_v31 = vpop.f32.mrb[8].mxu1 }
 0x2a0   :  { %v473_v32 = vadd.f32 %v623_v31, %v507_v18  ;;  %v467_v33 = vpop.f32.mrb[9].mxu1 }
 0x2a1   :  { %v468_v34 = vadd.f32 %v507_v18, %v467_v33 }
 0x2a2   :  { %484 = vst.msk [vmem:[%s844_s7 + $0x38] sm:$0xff] %vm476_vm2, %v473_v32 }
 0x2a3   :  { %483 = vst.msk [vmem:[%s844_s7 + $0x30] sm:$0xff] %vm476_vm2, %v468_v34 }

</bundles_post_ra>
